<compile_context>
chip_gen: v7x
topology: tpu7x:2x2x1
jax: 0.10.0
libtpu: 0.0.40
codegen_flags: <defaults>
</compile_context>

<pallas_src>
import functools

import jax
import jax.numpy as jnp
from jax.experimental import pallas as pl
from jax.experimental.pallas import tpu as pltpu

LN_EPS = 1e-5  # torch.nn.LayerNorm default


def _round_up(x, m):
    return (x + m - 1) // m * m


def gtrxl_kernel(h_ref, wt_ref, b_ref, out_ref):
    """Fused LayerNorm -> Linear -> ReLU -> skip-add for one row tile.

    h_ref:   (TM, D)  input rows (also the skip connection)
    wt_ref:  (D, D)   gamma-folded, pre-transposed Linear weight (y_norm @ Wt)
    b_ref:   (1, D)   beta-folded Linear bias
    out_ref: (TM, D)
    """
    x = h_ref[...].astype(jnp.float32)

    # LayerNorm statistics over the hidden (lane) dimension; affine is folded
    # into the weight/bias, so only the normalization is done here.
    mean = jnp.mean(x, axis=-1, keepdims=True)
    centered = x - mean
    var = jnp.mean(centered * centered, axis=-1, keepdims=True)
    y = centered * jax.lax.rsqrt(var + LN_EPS)

    # Inner dimension-preserving layer: Linear(dim, dim) on the MXU.
    z = jnp.dot(y, wt_ref[...].astype(jnp.float32),
                preferred_element_type=jnp.float32)
    z = z + b_ref[...].astype(jnp.float32)

    # Gating = skip connection + ReLU(layer output).
    out_ref[...] = (x + jnp.maximum(z, 0.0)).astype(out_ref.dtype)


@functools.partial(jax.jit, static_argnames=("tm",))
def gtrxl_layer_wrapper(h, gamma, beta, w, b, *, tm=512):
    """h: (batch, seq, dim). Returns same shape.

    Matches:  out = h + relu( LayerNorm(h) @ W.T + b )
    """
    B, S, D = h.shape
    rows = B * S
    itemsize = jnp.dtype(h.dtype).itemsize

    # Effective row tile: big (amortize per-step overhead), multiple of 8
    # sublanes, but never larger than needed for small inputs.
    tm_eff = min(tm, _round_up(rows, 8))
    tm_eff = _round_up(tm_eff, 8)
    rows_padded = _round_up(rows, tm_eff)

    h2 = h.reshape(rows, D)
    if rows_padded != rows:
        # Zero-pad the tail; padded rows are normalized harmlessly (eps keeps
        # rsqrt finite) and sliced away below.
        h2 = jnp.pad(h2, ((0, rows_padded - rows), (0, 0)))

    # Fold LayerNorm affine into the Linear:  (n*g + be) @ W.T + b
    #   = n @ (g[:,None] * W.T) + (be @ W.T + b)
    wt_eff = (gamma[:, None] * w.T).astype(h.dtype)          # (D, D)
    b_eff = (beta @ w.T + b).reshape(1, D).astype(jnp.float32)

    grid = rows_padded // tm_eff

    # VMEM budget (double-buffered in/out tiles + resident weight + bias).
    vmem_needed = 2 * (2 * tm_eff * D + D * D + D) * 4 + (2 << 20)
    compiler_params = pltpu.CompilerParams(
        dimension_semantics=("parallel",),
        vmem_limit_bytes=vmem_needed if vmem_needed > (32 << 20) else None,
    )

    cost = pl.CostEstimate(
        flops=2 * rows * D * D,
        transcendentals=rows,  # one rsqrt per row
        bytes_accessed=2 * rows * D * itemsize + D * D * itemsize + D * 4,
    )

    out = pl.pallas_call(
        gtrxl_kernel,
        out_shape=jax.ShapeDtypeStruct((rows_padded, D), h.dtype),
        grid_spec=pltpu.PrefetchScalarGridSpec(
            num_scalar_prefetch=0,
            grid=(grid,),
            in_specs=[
                pl.BlockSpec((tm_eff, D), lambda i: (i, 0)),   # h row tile
                pl.BlockSpec((D, D), lambda i: (0, 0)),        # folded W^T
                pl.BlockSpec((1, D), lambda i: (0, 0)),        # folded bias
            ],
            out_specs=pl.BlockSpec((tm_eff, D), lambda i: (i, 0)),
        ),
        compiler_params=compiler_params,
        cost_estimate=cost,
    )(h2, wt_eff, b_eff)

    if rows_padded != rows:
        out = out[:rows]
    return out.reshape(B, S, D)


def reference(h, gamma, beta, w, b):
    """Pure-JAX reference of the PyTorch forward (mem=None branch)."""
    mean = jnp.mean(h, axis=-1, keepdims=True)
    var = jnp.mean((h - mean) ** 2, axis=-1, keepdims=True)
    y = (h - mean) / jnp.sqrt(var + LN_EPS) * gamma + beta
    z = y @ w.T + b
    return h + jnp.maximum(z, 0.0)


if __name__ == "__main__":
    key = jax.random.PRNGKey(0)
    k_h, k_w, k_b, k_g, k_be = jax.random.split(key, 5)

    batch, seq, dim = 2, 8, 128   # hidden dim on the 128-lane axis

    h = jax.random.normal(k_h, (batch, seq, dim), dtype=jnp.float32)

    # Shapes follow nn.LayerNorm([dim]) and an nn.Linear(dim, dim) inner layer.
    w = jax.random.normal(k_w, (dim, dim), dtype=jnp.float32) * (1.0 / dim ** 0.5)
    b = jax.random.normal(k_b, (dim,), dtype=jnp.float32) * 0.02
    gamma = 1.0 + 0.1 * jax.random.normal(k_g, (dim,), dtype=jnp.float32)
    beta = 0.1 * jax.random.normal(k_be, (dim,), dtype=jnp.float32)

    out = gtrxl_layer_wrapper(h, gamma, beta, w, b)
    out = jax.block_until_ready(out)

    ref = reference(h, gamma, beta, w, b)
    assert out.shape == (batch, seq, dim)
    assert jnp.allclose(out, ref, atol=1e-4, rtol=1e-4), "mismatch vs reference"

    # Also exercise a ragged row count (tail padding path).
    h3 = jax.random.normal(k_h, (3, 7, dim), dtype=jnp.float32)
    out3 = jax.block_until_ready(gtrxl_layer_wrapper(h3, gamma, beta, w, b))
    ref3 = reference(h3, gamma, beta, w, b)
    assert jnp.allclose(out3, ref3, atol=1e-4, rtol=1e-4), "mismatch (ragged)"

    print("KERNEL_OK")
</pallas_src>

<mosaic_0001>
module attributes {stable_mosaic.version = 11 : i64} {
  func.func @gtrxl_kernel(%arg0: i32, %arg1: memref<16x128xf32, #tpu.memory_space<vmem>>, %arg2: memref<128x128xf32, #tpu.memory_space<vmem>>, %arg3: memref<1x128xf32, #tpu.memory_space<vmem>>, %arg4: memref<16x128xf32, #tpu.memory_space<vmem>>) attributes {dimension_semantics = [#tpu.dimension_semantics<parallel>], iteration_bounds = array<i64: 1>, scalar_prefetch = 0 : i64, scratch_operands = 0 : i64, tpu.core_type = #tpu.core_type<tc>, window_params = [{transform_indices = @transform_0, window_bounds = array<i64: 16, 128>}, {pipeline_mode = #tpu.pipeline_mode<synchronous>, transform_indices = @transform_1, window_bounds = array<i64: 128, 128>}, {pipeline_mode = #tpu.pipeline_mode<synchronous>, transform_indices = @transform_2, window_bounds = array<i64: 1, 128>}, {transform_indices = @transform_3, window_bounds = array<i64: 16, 128>}]} {
    %c0 = arith.constant 0 : index
    %c0_0 = arith.constant 0 : index
    %0 = vector.load %arg1[%c0, %c0_0] : memref<16x128xf32, #tpu.memory_space<vmem>>, vector<16x128xf32>
    %cst = arith.constant dense<0.000000e+00> : vector<16xf32>
    %1 = vector.multi_reduction <add>, %0, %cst [1] : vector<16x128xf32> to vector<16xf32>
    %2 = vector.shape_cast %1 : vector<16xf32> to vector<16x1xf32>
    %cst_1 = arith.constant 1.280000e+02 : f32
    %3 = vector.broadcast %cst_1 : f32 to vector<16x1xf32>
    %4 = arith.divf %2, %3 : vector<16x1xf32>
    %5 = vector.broadcast %4 : vector<16x1xf32> to vector<16x128xf32>
    %6 = arith.subf %0, %5 : vector<16x128xf32>
    %7 = arith.mulf %6, %6 : vector<16x128xf32>
    %cst_2 = arith.constant dense<0.000000e+00> : vector<16xf32>
    %8 = vector.multi_reduction <add>, %7, %cst_2 [1] : vector<16x128xf32> to vector<16xf32>
    %9 = vector.shape_cast %8 : vector<16xf32> to vector<16x1xf32>
    %cst_3 = arith.constant 1.280000e+02 : f32
    %10 = vector.broadcast %cst_3 : f32 to vector<16x1xf32>
    %11 = arith.divf %9, %10 : vector<16x1xf32>
    %cst_4 = arith.constant 9.99999974E-6 : f32
    %12 = vector.broadcast %cst_4 : f32 to vector<16x1xf32>
    %13 = arith.addf %11, %12 : vector<16x1xf32>
    %14 = math.rsqrt %13 : vector<16x1xf32>
    %15 = vector.broadcast %14 : vector<16x1xf32> to vector<16x128xf32>
    %16 = arith.mulf %6, %15 : vector<16x128xf32>
    %c0_5 = arith.constant 0 : index
    %c0_6 = arith.constant 0 : index
    %17 = vector.load %arg2[%c0_5, %c0_6] : memref<128x128xf32, #tpu.memory_space<vmem>>, vector<128x128xf32>
    %cst_7 = arith.constant dense<0.000000e+00> : vector<16x128xf32>
    %18 = tpu.matmul %16, %17, %cst_7 {dimension_numbers = #tpu.dot_dimension_numbers<[1], [0], [0], [1], [0, 0, 1, 1], [], []>} : vector<16x128xf32>, vector<128x128xf32>, vector<16x128xf32> -> vector<16x128xf32>
    %c0_8 = arith.constant 0 : index
    %c0_9 = arith.constant 0 : index
    %19 = vector.load %arg3[%c0_8, %c0_9] : memref<1x128xf32, #tpu.memory_space<vmem>>, vector<1x128xf32>
    %20 = vector.broadcast %19 : vector<1x128xf32> to vector<16x128xf32>
    %21 = arith.addf %18, %20 : vector<16x128xf32>
    %cst_10 = arith.constant 0.000000e+00 : f32
    %22 = vector.broadcast %cst_10 : f32 to vector<16x128xf32>
    %23 = arith.maximumf %21, %22 : vector<16x128xf32>
    %24 = arith.addf %0, %23 : vector<16x128xf32>
    %c0_11 = arith.constant 0 : index
    %c0_12 = arith.constant 0 : index
    %25 = vector.load %arg4[%c0_11, %c0_12] : memref<16x128xf32, #tpu.memory_space<vmem>>, vector<16x128xf32>
    tpu.vector_store %arg4[%c0_11, %c0_12], %24 {strides = array<i32>} : memref<16x128xf32, #tpu.memory_space<vmem>>, vector<16x128xf32>,
    return
  }
  func.func @transform_0(%arg0: i32) -> (i32, i32) {
    %c0_i32 = arith.constant 0 : i32
    %c0_i32_0 = arith.constant 0 : i32
    return %arg0, %c0_i32 : i32, i32
  }
  func.func @transform_1(%arg0: i32) -> (i32, i32) {
    %c0_i32 = arith.constant 0 : i32
    %c0_i32_0 = arith.constant 0 : i32
    %c0_i32_1 = arith.constant 0 : i32
    return %c0_i32, %c0_i32_0 : i32, i32
  }
  func.func @transform_2(%arg0: i32) -> (i32, i32) {
    %c0_i32 = arith.constant 0 : i32
    %c0_i32_0 = arith.constant 0 : i32
    %c0_i32_1 = arith.constant 0 : i32
    return %c0_i32, %c0_i32_0 : i32, i32
  }
  func.func @transform_3(%arg0: i32) -> (i32, i32) {
    %c0_i32 = arith.constant 0 : i32
    %c0_i32_0 = arith.constant 0 : i32
    return %arg0, %c0_i32 : i32, i32
  }
}

</mosaic_0001>

<bundles_post_ra>
// kernel: gtrxl_layer_wrapper.1
= control target key start
LH: loop header
LB: loop body
LE: loop exit
PB: predicated region body
PF: predicated region fallthrough
CT: control target
= control target key end

     0   :  { %s379_s0 = inlined_call_operand.vmem [shape: f32[16,128], index: 0, kind: input, shape index: {}]   ;;  %s380_s1 = inlined_call_operand.vmem [shape: f32[128,128], index: 1, kind: input, shape index: {}]   ;;  %s381_s2 = inlined_call_operand.vmem [shape: f32[1,128], index: 2, kind: input, shape index: {}]   ;;  %s382_s3 = inlined_call_operand.hbm [shape: f32[16,128], index: 3, kind: output, shape index: {}]  }
   0x1   :  { %v303_v0 = vld [vmem:[%s379_s0] sm:$0xff] }
   0x2   :  { %8 = vsyncpa [#allocation3], 0  ;;  %17 = vadd.xlane.f32.xlu0 %v303_v0  ;;  %v309_v1 = vld [vmem:[%s379_s0 + $0x8] sm:$0xff]  ;;  %v40_v2 = vld [vmem:[%s380_s1] sm:$0xff]  ;;  %s277_s21 = smov [#allocation2]  }
   0x3   :  { %v41_v3 = vld [vmem:[%s380_s1 + $0x8] sm:$0xff]  ;;  %v42_v4 = vld [vmem:[%s380_s1 + $0x10] sm:$0xff]  ;;  %v43_v6 = vld [vmem:[%s380_s1 + $0x18] sm:$0xff]  ;;  %s149_s22 = sshll.u32 %s277_s21, 4  ;;  %s150_s22 = int_to_ptr.vmem [resolvable:$true] %s149_s22 }
   0x4   :  { %v214_v5 = vpack.c.bf16 %v41_v3, %v40_v2  ;;  %v218_v7 = vpack.c.bf16 %v43_v6, %v42_v4  ;;  %v44_v8 = vld [vmem:[%s380_s1 + $0x20] sm:$0xff]  ;;  %v45_v9 = vld [vmem:[%s380_s1 + $0x28] sm:$0xff]  ;;  %v46_v19 = vld [vmem:[%s380_s1 + $0x30] sm:$0xff]  ;;  %s253_s23 = scalar_lea.vmem %s150_s22, 256  ;;  %p258_p1 = scmp.lt.s32.totalorder %s150_s22, %s150_s22 }
   0x5   :  { %v222_v10 = vpack.c.bf16 %v45_v9, %v44_v8  ;;  %v47_v20 = vld [vmem:[%s380_s1 + $0x38] sm:$0xff]  ;;  %v48_v22 = vld [vmem:[%s380_s1 + $0x40] sm:$0xff]  ;;  %v49_v23 = vld [vmem:[%s380_s1 + $0x48] sm:$0xff]  ;;  %p254_p0 = scmp.ne.s32.totalorder %s150_s22, %s253_s23  ;;  %p259_p2 = scmp.lt.s32.totalorder %s253_s23, %s253_s23 }
   0x6   :  { %19 = vadd.xlane.f32.xlu0 %v309_v1  ;;  %215 = vmatprep.subr.bf16.mxu0 %v214_v5  ;;  %v226_v21 = vpack.c.bf16 %v47_v20, %v46_v19  ;;  %v230_v24 = vpack.c.bf16 %v49_v23, %v48_v22  ;;  %v50_v25 = vld [vmem:[%s380_s1 + $0x50] sm:$0xff]  ;;  %v51_v26 = vld [vmem:[%s380_s1 + $0x58] sm:$0xff]  ;;  %v52_v28 = vld [vmem:[%s380_s1 + $0x60] sm:$0xff] }
   0x7   :  { %217 = vmatpush3.bf16.msra.mxu0 %v214_v5  ;;  %v234_v27 = vpack.c.bf16 %v51_v26, %v50_v25  ;;  %v53_v29 = vld [vmem:[%s380_s1 + $0x68] sm:$0xff]  ;;  %v54_v30 = vld [vmem:[%s380_s1 + $0x70] sm:$0xff]  ;;  %v55_v32 = vld [vmem:[%s380_s1 + $0x78] sm:$0xff]  ;;  %p260_p3 = por %p259_p2, %p258_p1 }
   0x8   :  { %219 = vmatprep.subr.bf16.mxu0 %v218_v7  ;;  %v238_v31 = vpack.c.bf16 %v53_v29, %v52_v28  ;;  %v242_v33 = vpack.c.bf16 %v55_v32, %v54_v30  ;;  %v160_v44 = vld [vmem:[%s381_s2] ss:$0 sm:$0xff] }
   0x9   :  { %p261_p4 = pnand %p260_p3, %p254_p0 }
   0xb   :  { %221 = vmatpush3.bf16.msra.mxu0 %v218_v7 }
   0xc   :  { %223 = vmatprep.subr.bf16.mxu0 %v222_v10 }
   0xf   :  { %225 = vmatpush3.bf16.msra.mxu0 %v222_v10 }
  0x10   :  { %227 = vmatprep.subr.bf16.mxu0 %v226_v21 }
  0x13   :  { %229 = vmatpush3.bf16.msra.mxu0 %v226_v21 }
  0x14   :  { %231 = vmatprep.subr.bf16.mxu0 %v230_v24 }
  0x17   :  { %233 = vmatpush3.bf16.msra.mxu0 %v230_v24 }
  0x18   :  { %235 = vmatprep.subr.bf16.mxu0 %v234_v27 }
  0x1b   :  { %237 = vmatpush3.bf16.msra.mxu0 %v234_v27 }
  0x1c   :  { %239 = vmatprep.subr.bf16.mxu0 %v238_v31 }
  0x1f   :  { %241 = vmatpush3.bf16.msra.mxu0 %v238_v31 }
  0x20   :  { %243 = vmatprep.subr.bf16.mxu0 %v242_v33 }
  0x23   :  { %245 = vmatpush3.bf16.msra.mxu0 %v242_v33 }
  0x8f   :  { %v18_v11 = vpop.xlane.xlu0 %17 }
  0x90   :  { %v22_v12 = vmul.f32 0.0078125, %v18_v11 }
  0x92   :  { %v24_v13 = vsub.f32 %v303_v0, %v22_v12 }
  0x93   :  { %v20_v14 = vpop.xlane.xlu0 %19 }
  0x94   :  { %v23_v15 = vmul.f32 0.0078125, %v20_v14  ;;  %v26_v16 = vmul.f32 %v24_v13, %v24_v13 }
  0x96   :  { %v25_v17 = vsub.f32 %v309_v1, %v23_v15  ;;  %28 = vadd.xlane.f32.xlu1 %v26_v16 }
  0x98   :  { %v27_v18 = vmul.f32 %v25_v17, %v25_v17 }
  0x9a   :  { %30 = vadd.xlane.f32.xlu1 %v27_v18 }
 0x123   :  { %v29_v34 = vpop.xlane.xlu1 %28 }
 0x124   :  { %v32_v35 = vmul.f32 0.0078125, %v29_v34 }
 0x126   :  { %v34_v36 = vadd.f32 1e-05, %v32_v35 }
 0x127   :  { %v31_v37 = vpop.xlane.xlu1 %30 }
 0x128   :  { %249 = vrsqrt.f32 %v34_v36  ;;  %v33_v38 = vmul.f32 0.0078125, %v31_v37 }
 0x12a   :  { %v35_v39 = vadd.f32 1e-05, %v33_v38 }
 0x12c   :  { %251 = vrsqrt.f32 %v35_v39 }
 0x132   :  { %v250_v40 = vpop.eup %249 }
 0x133   :  { %v38_v41 = vmul.f32 %v250_v40, %v24_v13 }
 0x135   :  { %211 = vmatprep.mubr.f32.mxu0 %v38_v41 }
 0x136   :  { %v252_v42 = vpop.eup %251 }
 0x137   :  { %v39_v43 = vmul.f32 %v252_v42, %v25_v17 }
 0x139   :  { %212 = vmatmul.mubr.f32.vlgmr.msra.gmra.mrb[0].mxu0 %v39_v43 }
 0x20c   :  { %v213_v45 = vpop.f32.mrb[0].mxu0 }
 0x20d   :  { %v135_v46 = vadd.f32 %v213_v45, %v160_v44  ;;  %v129_v47 = vpop.f32.mrb[1].mxu0 }
 0x20e   :  { %v130_v48 = vadd.f32 %v160_v44, %v129_v47 }
 0x20f   :  { %v139_v49 = vmax.f32 %v135_v46, 0.0 }
 0x210   :  { %v138_v50 = vmax.f32 %v130_v48, 0.0 }
 0x211   :  { %v141_v51 = vadd.f32 %v139_v49, %v309_v1 }
 0x212   :  { %v140_v52 = vadd.f32 %v138_v50, %v303_v0 }
 0x213   :  { %143 = vst [vmem:[#allocation2 + $0x8] sm:$0xff] %v141_v51 }
 0x214   :  { %142 = vst [vmem:[#allocation2] sm:$0xff] %v140_v52 }
 0x215   :  { %264 = shalt.err (!%p261_p4)
}
 0x216   :  { %s265_s24 = scalar_lea.hbm %s382_s3, 256 }
 0x217   :  { %p266_p5 = scmp.ne.s32.totalorder %s382_s3, %s265_s24  ;;  %p269_p6 = scmp.lt.u32.totalorder %s265_s24, %s382_s3 }
 0x219   :  { %p271_p7 = pnand %p269_p6, %p266_p5 }
 0x21b   :  { %274 = shalt.err (!%p271_p7)
}
 0x21c   :  { %s278_s29 = smov 128   ;;  %s279_s30 = smov 8  }
 0x21d   :  { %155 = dma.vmem_to_hbm [thread:$0]  %s150_s22, 256, %s382_s3, [#allocation3], %s278_s29, %s278_s29, %s279_s30  }
 0x21e   :  { %275 = dma.done.wait [#allocation3], 256  }
 0x21f   :  { %276 = vsyncadd [#allocation3], 4294967040 }
 0x220   :  { %159 = vsyncpa [#allocation3], 1 }

</bundles_post_ra>
